<compile_context>
chip_gen: v7x
topology: tpu7x:2x2x1
jax: 0.10.0
libtpu: 0.0.40
codegen_flags: <defaults>
</compile_context>

<pallas_src>
import functools

import jax
import jax.numpy as jnp
import numpy as np
from jax import lax
from jax.experimental import pallas as pl
from jax.experimental.pallas import tpu as pltpu

_FEAT = 5            # base_network output dim
_COLS = _FEAT + 1    # + fused classifier column


def _round_up(x, m):
    return ((x + m - 1) // m) * m


def da_kernel(x_ref, w_ref, b_ref,            # inputs
              clf_ref, loss_ref,              # outputs
              gs_ref, gt_ref, ss_ref, st_ref, eye_ref,   # VMEM scratch
              *, ns, nt):
    i = pl.program_id(0)
    bm = x_ref.shape[0]

    @pl.when(i == 0)
    def _init():
        gs_ref[...] = jnp.zeros_like(gs_ref)
        gt_ref[...] = jnp.zeros_like(gt_ref)
        ss_ref[...] = jnp.zeros_like(ss_ref)
        st_ref[...] = jnp.zeros_like(st_ref)
        r = lax.broadcasted_iota(jnp.int32, (bm, bm), 0)
        c = lax.broadcasted_iota(jnp.int32, (bm, bm), 1)
        eye_ref[...] = (r == c).astype(jnp.float32)

    # One fused MXU pass per tile:
    #   cols 0..4 : x @ w1 + b1                       (features, for CORAL)
    #   col  5    : x @ (w1 @ w2) + (b1 @ w2 + b2)    (classifier pre-act)
    h = jnp.dot(x_ref[...], w_ref[...],
                preferred_element_type=jnp.float32) + b_ref[...]     # (bm, 6)

    # Row masks: padded rows contribute nothing; split source vs. target.
    row = i * bm + lax.broadcasted_iota(jnp.int32, (bm, 1), 0)
    m_src = (row < ns).astype(jnp.float32)
    m_tgt = jnp.logical_and(row >= ns, row < ns + nt).astype(jnp.float32)
    hs = h * m_src
    ht = h * m_tgt

    # Accumulate CORAL statistics (Gram + column sums) across row tiles.
    dn0 = (((0,), (0,)), ((), ()))   # contract over rows: A^T @ B, no transpose op
    gs_ref[...] += lax.dot_general(hs, hs, dn0, preferred_element_type=jnp.float32)
    gt_ref[...] += lax.dot_general(ht, ht, dn0, preferred_element_type=jnp.float32)
    ss_ref[...] += jnp.sum(hs, axis=0, keepdims=True)
    st_ref[...] += jnp.sum(ht, axis=0, keepdims=True)

    # Lane-dense classifier store: transpose the (bm,1) head column to (1,bm)
    # via an identity matmul (MXU transpose), then store a full 128-lane row.
    head_col = h[:, _FEAT:_COLS]                                     # (bm, 1)
    head_row = lax.dot_general(head_col, eye_ref[...], dn0,
                               preferred_element_type=jnp.float32)   # (1, bm)
    clf_ref[...] = jax.nn.sigmoid(head_row).reshape(clf_ref.shape)

    @pl.when(i == pl.num_programs(0) - 1)
    def _finalize():
        sum_s = ss_ref[...][:, :_FEAT]                               # (1, 5)
        sum_t = st_ref[...][:, :_FEAT]
        gram_s = gs_ref[...][:_FEAT, :_FEAT]                         # (5, 5)
        gram_t = gt_ref[...][:_FEAT, :_FEAT]
        # Mean-correction outer products: run exactly once per call, so the
        # tiny MXU round-trip here is negligible.
        cs = (gram_s - lax.dot_general(sum_s, sum_s, dn0,
                                       preferred_element_type=jnp.float32) / ns) / (ns - 1)
        ct = (gram_t - lax.dot_general(sum_t, sum_t, dn0,
                                       preferred_element_type=jnp.float32) / nt) / (nt - 1)
        diff = cs - ct
        # Reference: (cs-ct).pow(2).sum().sqrt() / (4*d*d), d = 5.
        loss = jnp.sqrt(jnp.sum(diff * diff)) / (4.0 * _FEAT * _FEAT)
        loss_ref[...] = jnp.full((1, 1), loss, dtype=jnp.float32)


def da_forward(source, target, w1, b1, w2, b2, *, block_rows=512):
    ns, d_in = source.shape
    nt, d_in2 = target.shape
    assert d_in == d_in2
    if ns < 2 or nt < 2:
        raise ValueError("CORAL requires ns >= 2 and nt >= 2 (divides by ns-1/nt-1).")

    n = ns + nt
    bm = min(_round_up(block_rows, 128), _round_up(n, 128))  # multiple of 128
    n_pad = _round_up(n, bm)
    nblk = n_pad // bm

    # One operand for both domains -> one matmul / one DMA stream per tile.
    x = jnp.concatenate([source, target], axis=0).astype(jnp.float32)
    x = jnp.pad(x, ((0, n_pad - n), (0, 0)))

    # Fused weights / bias (wrapper-side, tiny).
    w_cat = jnp.concatenate([w1, w1 @ w2], axis=1).astype(jnp.float32)        # (D, 6)
    b_cat = jnp.concatenate([b1, b1 @ w2 + b2], axis=1).astype(jnp.float32)   # (1, 6)

    kernel = functools.partial(da_kernel, ns=ns, nt=nt)

    clf, loss = pl.pallas_call(
        kernel,
        out_shape=(
            jax.ShapeDtypeStruct((nblk, 1, bm), jnp.float32),  # lane-dense clf slab
            jax.ShapeDtypeStruct((1, 1), jnp.float32),         # CORAL loss
        ),
        grid=(nblk,),
        in_specs=[
            pl.BlockSpec((bm, d_in), lambda i: (i, 0)),
            pl.BlockSpec((d_in, _COLS), lambda i: (0, 0)),
            pl.BlockSpec((1, _COLS), lambda i: (0, 0)),
        ],
        out_specs=(
            pl.BlockSpec((1, 1, bm), lambda i: (i, 0, 0)),
            pl.BlockSpec((1, 1), lambda i: (0, 0)),
        ),
        scratch_shapes=[
            pltpu.VMEM((_COLS, _COLS), jnp.float32),   # source Gram accumulator
            pltpu.VMEM((_COLS, _COLS), jnp.float32),   # target Gram accumulator
            pltpu.VMEM((1, _COLS), jnp.float32),       # source column-sum accumulator
            pltpu.VMEM((1, _COLS), jnp.float32),       # target column-sum accumulator
            pltpu.VMEM((bm, bm), jnp.float32),         # identity for MXU transpose
        ],
        compiler_params=pltpu.CompilerParams(
            # The row-tile axis carries the CORAL accumulators -> sequential.
            # TODO(synk): per-core partial Gram accumulators + a combine step
            # would let this axis be "parallel" and use both v7x TensorCores.
            dimension_semantics=("arbitrary",),
            vmem_limit_bytes=32 * 1024 * 1024,
        ),
    )(x, w_cat, b_cat)

    clf_flat = clf.reshape(n_pad)[:n]
    source_clf = clf_flat[:ns].reshape(ns, 1)
    tgt_clf = clf_flat[ns:].reshape(nt, 1)
    return source_clf, tgt_clf, loss[0, 0]


def da_reference(source, target, w1, b1, w2, b2):
    """Pure-JAX reference mirroring the PyTorch DA module."""
    fs = source @ w1 + b1
    ft = target @ w1 + b1
    sclf = jax.nn.sigmoid(fs @ w2 + b2)
    tclf = jax.nn.sigmoid(ft @ w2 + b2)
    d = fs.shape[1]
    ns, nt = fs.shape[0], ft.shape[0]
    ts = jnp.sum(fs, axis=0, keepdims=True)
    cs = (fs.T @ fs - ts.T @ ts / ns) / (ns - 1)
    tt = jnp.sum(ft, axis=0, keepdims=True)
    ct = (ft.T @ ft - tt.T @ tt / nt) / (nt - 1)
    loss = jnp.sqrt(jnp.sum((cs - ct) ** 2)) / (4.0 * d * d)
    return sclf, tclf, loss


def init_da_params(key, input_dim, hidden=_FEAT, out=1):
    # Mimics PyTorch Linear init: U(-1/sqrt(fan_in), 1/sqrt(fan_in)).
    k1, k2, k3, k4 = jax.random.split(key, 4)
    bound1 = 1.0 / jnp.sqrt(input_dim)
    bound2 = 1.0 / jnp.sqrt(hidden)
    w1 = jax.random.uniform(k1, (input_dim, hidden), jnp.float32, -bound1, bound1)
    b1 = jax.random.uniform(k2, (1, hidden), jnp.float32, -bound1, bound1)
    w2 = jax.random.uniform(k3, (hidden, out), jnp.float32, -bound2, bound2)
    b2 = jax.random.uniform(k4, (1, out), jnp.float32, -bound2, bound2)
    return w1, b1, w2, b2


if __name__ == "__main__":
    key = jax.random.PRNGKey(0)
    k_src, k_tgt, k_par = jax.random.split(key, 3)

    NS, NT, D = 8, 8, 32
    source = jax.random.normal(k_src, (NS, D), jnp.float32)
    target = jax.random.normal(k_tgt, (NT, D), jnp.float32)
    w1, b1, w2, b2 = init_da_params(k_par, D)

    source_clf, tgt_clf, transfer_loss = da_forward(source, target, w1, b1, w2, b2)
    jax.block_until_ready((source_clf, tgt_clf, transfer_loss))

    assert source_clf.shape == (NS, 1)
    assert tgt_clf.shape == (NT, 1)
    assert transfer_loss.shape == ()

    ref_s, ref_t, ref_l = da_reference(source, target, w1, b1, w2, b2)
    np.testing.assert_allclose(np.asarray(source_clf), np.asarray(ref_s),
                               rtol=1e-3, atol=1e-3)
    np.testing.assert_allclose(np.asarray(tgt_clf), np.asarray(ref_t),
                               rtol=1e-3, atol=1e-3)
    np.testing.assert_allclose(float(transfer_loss), float(ref_l),
                               rtol=1e-3, atol=1e-3)

    print("KERNEL_OK")
</pallas_src>

<mosaic_0001>
module attributes {stable_mosaic.version = 11 : i64} {
  func.func @da_kernel(%arg0: i32, %arg1: memref<128x32xf32, #tpu.memory_space<vmem>>, %arg2: memref<32x6xf32, #tpu.memory_space<vmem>>, %arg3: memref<1x6xf32, #tpu.memory_space<vmem>>, %arg4: memref<1x1x128xf32, #tpu.memory_space<vmem>>, %arg5: memref<1x1xf32, #tpu.memory_space<vmem>>, %arg6: memref<6x6xf32, #tpu.memory_space<vmem>>, %arg7: memref<6x6xf32, #tpu.memory_space<vmem>>, %arg8: memref<1x6xf32, #tpu.memory_space<vmem>>, %arg9: memref<1x6xf32, #tpu.memory_space<vmem>>, %arg10: memref<128x128xf32, #tpu.memory_space<vmem>>) attributes {dimension_semantics = [#tpu.dimension_semantics<arbitrary>], iteration_bounds = array<i64: 1>, scalar_prefetch = 0 : i64, scratch_operands = 5 : i64, tpu.core_type = #tpu.core_type<tc>, window_params = [{transform_indices = @transform_0, window_bounds = array<i64: 128, 32>}, {pipeline_mode = #tpu.pipeline_mode<synchronous>, transform_indices = @transform_1, window_bounds = array<i64: 32, 6>}, {pipeline_mode = #tpu.pipeline_mode<synchronous>, transform_indices = @transform_2, window_bounds = array<i64: 1, 6>}, {transform_indices = @transform_3, window_bounds = array<i64: 1, 1, 128>}, {pipeline_mode = #tpu.pipeline_mode<synchronous>, transform_indices = @transform_4, window_bounds = array<i64: 1, 1>}]} {
    %c0_i32 = arith.constant 0 : i32
    %0 = arith.cmpi eq, %arg0, %c0_i32 : i32
    %1 = arith.extui %0 : i1 to i32
    %c0_i32_0 = arith.constant 0 : i32
    %2 = arith.cmpi ne, %1, %c0_i32_0 : i32
    scf.if %2 {
      %cst_36 = arith.constant 0.000000e+00 : f32
      %59 = vector.broadcast %cst_36 : f32 to vector<6x6xf32>
      %c0_37 = arith.constant 0 : index
      %c0_38 = arith.constant 0 : index
      %60 = vector.load %arg6[%c0_37, %c0_38] : memref<6x6xf32, #tpu.memory_space<vmem>>, vector<6x6xf32>
      tpu.vector_store %arg6[%c0_37, %c0_38], %59 {strides = array<i32>} : memref<6x6xf32, #tpu.memory_space<vmem>>, vector<6x6xf32>,
      %cst_39 = arith.constant 0.000000e+00 : f32
      %61 = vector.broadcast %cst_39 : f32 to vector<6x6xf32>
      %c0_40 = arith.constant 0 : index
      %c0_41 = arith.constant 0 : index
      %62 = vector.load %arg7[%c0_40, %c0_41] : memref<6x6xf32, #tpu.memory_space<vmem>>, vector<6x6xf32>
      tpu.vector_store %arg7[%c0_40, %c0_41], %61 {strides = array<i32>} : memref<6x6xf32, #tpu.memory_space<vmem>>, vector<6x6xf32>,
      %cst_42 = arith.constant 0.000000e+00 : f32
      %63 = vector.broadcast %cst_42 : f32 to vector<1x6xf32>
      %c0_43 = arith.constant 0 : index
      %c0_44 = arith.constant 0 : index
      %64 = vector.load %arg8[%c0_43, %c0_44] : memref<1x6xf32, #tpu.memory_space<vmem>>, vector<1x6xf32>
      tpu.vector_store %arg8[%c0_43, %c0_44], %63 {strides = array<i32>} : memref<1x6xf32, #tpu.memory_space<vmem>>, vector<1x6xf32>,
      %cst_45 = arith.constant 0.000000e+00 : f32
      %65 = vector.broadcast %cst_45 : f32 to vector<1x6xf32>
      %c0_46 = arith.constant 0 : index
      %c0_47 = arith.constant 0 : index
      %66 = vector.load %arg9[%c0_46, %c0_47] : memref<1x6xf32, #tpu.memory_space<vmem>>, vector<1x6xf32>
      tpu.vector_store %arg9[%c0_46, %c0_47], %65 {strides = array<i32>} : memref<1x6xf32, #tpu.memory_space<vmem>>, vector<1x6xf32>,
      %67 = tpu.iota {dimensions = array<i32: 0>} : vector<128x128xi32>
      %68 = tpu.iota {dimensions = array<i32: 1>} : vector<128x128xi32>
      %69 = arith.cmpi eq, %67, %68 : vector<128x128xi32>
      %70 = arith.extui %69 : vector<128x128xi1> to vector<128x128xi32>
      %71 = arith.sitofp %70 : vector<128x128xi32> to vector<128x128xf32>
      %c0_48 = arith.constant 0 : index
      %c0_49 = arith.constant 0 : index
      %72 = vector.load %arg10[%c0_48, %c0_49] : memref<128x128xf32, #tpu.memory_space<vmem>>, vector<128x128xf32>
      tpu.vector_store %arg10[%c0_48, %c0_49], %71 {strides = array<i32>} : memref<128x128xf32, #tpu.memory_space<vmem>>, vector<128x128xf32>,
    } else {
    }
    %c0 = arith.constant 0 : index
    %c0_1 = arith.constant 0 : index
    %3 = vector.load %arg1[%c0, %c0_1] : memref<128x32xf32, #tpu.memory_space<vmem>>, vector<128x32xf32>
    %c0_2 = arith.constant 0 : index
    %c0_3 = arith.constant 0 : index
    %4 = vector.load %arg2[%c0_2, %c0_3] : memref<32x6xf32, #tpu.memory_space<vmem>>, vector<32x6xf32>
    %cst = arith.constant dense<0.000000e+00> : vector<128x6xf32>
    %5 = tpu.matmul %3, %4, %cst {dimension_numbers = #tpu.dot_dimension_numbers<[1], [0], [0], [1], [0, 0, 1, 1], [], []>} : vector<128x32xf32>, vector<32x6xf32>, vector<128x6xf32> -> vector<128x6xf32>
    %c0_4 = arith.constant 0 : index
    %c0_5 = arith.constant 0 : index
    %6 = vector.load %arg3[%c0_4, %c0_5] : memref<1x6xf32, #tpu.memory_space<vmem>>, vector<1x6xf32>
    %7 = vector.broadcast %6 : vector<1x6xf32> to vector<128x6xf32>
    %8 = arith.addf %5, %7 : vector<128x6xf32>
    %c128_i32 = arith.constant 128 : i32
    %9 = arith.muli %arg0, %c128_i32 : i32
    %10 = tpu.iota {dimensions = array<i32: 0>} : vector<128x1xi32>
    %11 = vector.broadcast %9 : i32 to vector<128x1xi32>
    %12 = arith.addi %11, %10 : vector<128x1xi32>
    %c8_i32 = arith.constant 8 : i32
    %13 = vector.broadcast %c8_i32 : i32 to vector<128x1xi32>
    %14 = arith.cmpi slt, %12, %13 : vector<128x1xi32>
    %15 = arith.extui %14 : vector<128x1xi1> to vector<128x1xi32>
    %16 = arith.sitofp %15 : vector<128x1xi32> to vector<128x1xf32>
    %c8_i32_6 = arith.constant 8 : i32
    %17 = vector.broadcast %c8_i32_6 : i32 to vector<128x1xi32>
    %18 = arith.cmpi sge, %12, %17 : vector<128x1xi32>
    %c16_i32 = arith.constant 16 : i32
    %19 = vector.broadcast %c16_i32 : i32 to vector<128x1xi32>
    %20 = arith.cmpi slt, %12, %19 : vector<128x1xi32>
    %21 = arith.andi %18, %20 : vector<128x1xi1>
    %22 = arith.extui %21 : vector<128x1xi1> to vector<128x1xi32>
    %23 = arith.sitofp %22 : vector<128x1xi32> to vector<128x1xf32>
    %24 = vector.broadcast %16 : vector<128x1xf32> to vector<128x6xf32>
    %25 = arith.mulf %8, %24 : vector<128x6xf32>
    %26 = vector.broadcast %23 : vector<128x1xf32> to vector<128x6xf32>
    %27 = arith.mulf %8, %26 : vector<128x6xf32>
    %c0_7 = arith.constant 0 : index
    %c0_8 = arith.constant 0 : index
    %28 = vector.load %arg6[%c0_7, %c0_8] : memref<6x6xf32, #tpu.memory_space<vmem>>, vector<6x6xf32>
    %cst_9 = arith.constant dense<0.000000e+00> : vector<6x6xf32>
    %29 = tpu.matmul %25, %25, %cst_9 {dimension_numbers = #tpu.dot_dimension_numbers<[0], [0], [1], [1], [0, 1, 1, 1], [], []>} : vector<128x6xf32>, vector<128x6xf32>, vector<6x6xf32> -> vector<6x6xf32>
    %30 = arith.addf %28, %29 : vector<6x6xf32>
    %c0_10 = arith.constant 0 : index
    %c0_11 = arith.constant 0 : index
    %31 = vector.load %arg6[%c0_10, %c0_11] : memref<6x6xf32, #tpu.memory_space<vmem>>, vector<6x6xf32>
    tpu.vector_store %arg6[%c0_10, %c0_11], %30 {strides = array<i32>} : memref<6x6xf32, #tpu.memory_space<vmem>>, vector<6x6xf32>,
    %c0_12 = arith.constant 0 : index
    %c0_13 = arith.constant 0 : index
    %32 = vector.load %arg7[%c0_12, %c0_13] : memref<6x6xf32, #tpu.memory_space<vmem>>, vector<6x6xf32>
    %cst_14 = arith.constant dense<0.000000e+00> : vector<6x6xf32>
    %33 = tpu.matmul %27, %27, %cst_14 {dimension_numbers = #tpu.dot_dimension_numbers<[0], [0], [1], [1], [0, 1, 1, 1], [], []>} : vector<128x6xf32>, vector<128x6xf32>, vector<6x6xf32> -> vector<6x6xf32>
    %34 = arith.addf %32, %33 : vector<6x6xf32>
    %c0_15 = arith.constant 0 : index
    %c0_16 = arith.constant 0 : index
    %35 = vector.load %arg7[%c0_15, %c0_16] : memref<6x6xf32, #tpu.memory_space<vmem>>, vector<6x6xf32>
    tpu.vector_store %arg7[%c0_15, %c0_16], %34 {strides = array<i32>} : memref<6x6xf32, #tpu.memory_space<vmem>>, vector<6x6xf32>,
    %c0_17 = arith.constant 0 : index
    %c0_18 = arith.constant 0 : index
    %36 = vector.load %arg8[%c0_17, %c0_18] : memref<1x6xf32, #tpu.memory_space<vmem>>, vector<1x6xf32>
    %cst_19 = arith.constant dense<0.000000e+00> : vector<6xf32>
    %37 = vector.multi_reduction <add>, %25, %cst_19 [0] : vector<128x6xf32> to vector<6xf32>
    %38 = vector.shape_cast %37 : vector<6xf32> to vector<1x6xf32>
    %39 = arith.addf %36, %38 : vector<1x6xf32>
    %c0_20 = arith.constant 0 : index
    %c0_21 = arith.constant 0 : index
    %40 = vector.load %arg8[%c0_20, %c0_21] : memref<1x6xf32, #tpu.memory_space<vmem>>, vector<1x6xf32>
    tpu.vector_store %arg8[%c0_20, %c0_21], %39 {strides = array<i32>} : memref<1x6xf32, #tpu.memory_space<vmem>>, vector<1x6xf32>,
    %c0_22 = arith.constant 0 : index
    %c0_23 = arith.constant 0 : index
    %41 = vector.load %arg9[%c0_22, %c0_23] : memref<1x6xf32, #tpu.memory_space<vmem>>, vector<1x6xf32>
    %cst_24 = arith.constant dense<0.000000e+00> : vector<6xf32>
    %42 = vector.multi_reduction <add>, %27, %cst_24 [0] : vector<128x6xf32> to vector<6xf32>
    %43 = vector.shape_cast %42 : vector<6xf32> to vector<1x6xf32>
    %44 = arith.addf %41, %43 : vector<1x6xf32>
    %c0_25 = arith.constant 0 : index
    %c0_26 = arith.constant 0 : index
    %45 = vector.load %arg9[%c0_25, %c0_26] : memref<1x6xf32, #tpu.memory_space<vmem>>, vector<1x6xf32>
    tpu.vector_store %arg9[%c0_25, %c0_26], %44 {strides = array<i32>} : memref<1x6xf32, #tpu.memory_space<vmem>>, vector<1x6xf32>,
    %46 = vector.extract_strided_slice %8 {offsets = [0, 5], sizes = [128, 1], strides = [1, 1]} : vector<128x6xf32> to vector<128x1xf32>
    %c0_27 = arith.constant 0 : index
    %c0_28 = arith.constant 0 : index
    %47 = vector.load %arg10[%c0_27, %c0_28] : memref<128x128xf32, #tpu.memory_space<vmem>>, vector<128x128xf32>
    %cst_29 = arith.constant dense<0.000000e+00> : vector<1x128xf32>
    %48 = tpu.matmul %46, %47, %cst_29 {dimension_numbers = #tpu.dot_dimension_numbers<[0], [0], [1], [1], [0, 1, 1, 1], [], []>} : vector<128x1xf32>, vector<128x128xf32>, vector<1x128xf32> -> vector<1x128xf32>
    %49 = arith.negf %48 : vector<1x128xf32>
    %50 = math.exp %49 : vector<1x128xf32>
    %cst_30 = arith.constant 1.000000e+00 : f32
    %51 = vector.broadcast %cst_30 : f32 to vector<1x128xf32>
    %52 = arith.addf %51, %50 : vector<1x128xf32>
    %53 = arith.divf %51, %52 : vector<1x128xf32>
    %54 = vector.shape_cast %53 : vector<1x128xf32> to vector<1x1x128xf32>
    %c0_31 = arith.constant 0 : index
    %c0_32 = arith.constant 0 : index
    %c0_33 = arith.constant 0 : index
    %55 = vector.load %arg4[%c0_31, %c0_32, %c0_33] : memref<1x1x128xf32, #tpu.memory_space<vmem>>, vector<1x1x128xf32>
    tpu.vector_store %arg4[%c0_31, %c0_32, %c0_33], %54 {strides = array<i32>} : memref<1x1x128xf32, #tpu.memory_space<vmem>>, vector<1x1x128xf32>,
    %c0_i32_34 = arith.constant 0 : i32
    %56 = arith.cmpi eq, %arg0, %c0_i32_34 : i32
    %57 = arith.extui %56 : i1 to i32
    %c0_i32_35 = arith.constant 0 : i32
    %58 = arith.cmpi ne, %57, %c0_i32_35 : i32
    scf.if %58 {
      %c0_36 = arith.constant 0 : index
      %c0_37 = arith.constant 0 : index
      %59 = vector.load %arg8[%c0_36, %c0_37] : memref<1x6xf32, #tpu.memory_space<vmem>>, vector<1x6xf32>
      %60 = vector.extract_strided_slice %59 {offsets = [0, 0], sizes = [1, 5], strides = [1, 1]} : vector<1x6xf32> to vector<1x5xf32>
      %c0_38 = arith.constant 0 : index
      %c0_39 = arith.constant 0 : index
      %61 = vector.load %arg9[%c0_38, %c0_39] : memref<1x6xf32, #tpu.memory_space<vmem>>, vector<1x6xf32>
      %62 = vector.extract_strided_slice %61 {offsets = [0, 0], sizes = [1, 5], strides = [1, 1]} : vector<1x6xf32> to vector<1x5xf32>
      %c0_40 = arith.constant 0 : index
      %c0_41 = arith.constant 0 : index
      %63 = vector.load %arg6[%c0_40, %c0_41] : memref<6x6xf32, #tpu.memory_space<vmem>>, vector<6x6xf32>
      %64 = vector.extract_strided_slice %63 {offsets = [0, 0], sizes = [5, 5], strides = [1, 1]} : vector<6x6xf32> to vector<5x5xf32>
      %c0_42 = arith.constant 0 : index
      %c0_43 = arith.constant 0 : index
      %65 = vector.load %arg7[%c0_42, %c0_43] : memref<6x6xf32, #tpu.memory_space<vmem>>, vector<6x6xf32>
      %66 = vector.extract_strided_slice %65 {offsets = [0, 0], sizes = [5, 5], strides = [1, 1]} : vector<6x6xf32> to vector<5x5xf32>
      %cst_44 = arith.constant dense<0.000000e+00> : vector<5x5xf32>
      %67 = tpu.matmul %60, %60, %cst_44 {dimension_numbers = #tpu.dot_dimension_numbers<[0], [0], [1], [1], [0, 1, 1, 1], [], []>} : vector<1x5xf32>, vector<1x5xf32>, vector<5x5xf32> -> vector<5x5xf32>
      %cst_45 = arith.constant 8.000000e+00 : f32
      %68 = vector.broadcast %cst_45 : f32 to vector<5x5xf32>
      %69 = arith.divf %67, %68 : vector<5x5xf32>
      %70 = arith.subf %64, %69 : vector<5x5xf32>
      %cst_46 = arith.constant 7.000000e+00 : f32
      %71 = vector.broadcast %cst_46 : f32 to vector<5x5xf32>
      %72 = arith.divf %70, %71 : vector<5x5xf32>
      %cst_47 = arith.constant dense<0.000000e+00> : vector<5x5xf32>
      %73 = tpu.matmul %62, %62, %cst_47 {dimension_numbers = #tpu.dot_dimension_numbers<[0], [0], [1], [1], [0, 1, 1, 1], [], []>} : vector<1x5xf32>, vector<1x5xf32>, vector<5x5xf32> -> vector<5x5xf32>
      %cst_48 = arith.constant 8.000000e+00 : f32
      %74 = vector.broadcast %cst_48 : f32 to vector<5x5xf32>
      %75 = arith.divf %73, %74 : vector<5x5xf32>
      %76 = arith.subf %66, %75 : vector<5x5xf32>
      %cst_49 = arith.constant 7.000000e+00 : f32
      %77 = vector.broadcast %cst_49 : f32 to vector<5x5xf32>
      %78 = arith.divf %76, %77 : vector<5x5xf32>
      %79 = arith.subf %72, %78 : vector<5x5xf32>
      %80 = arith.mulf %79, %79 : vector<5x5xf32>
      %81 = vector.shape_cast %80 : vector<5x5xf32> to vector<1x5x5xf32>
      %cst_50 = arith.constant dense<0.000000e+00> : vector<1xf32>
      %82 = vector.multi_reduction <add>, %81, %cst_50 [1, 2] : vector<1x5x5xf32> to vector<1xf32>
      %83 = vector.shape_cast %82 : vector<1xf32> to vector<1x1x1xf32>
      %84 = vector.extract %83[0, 0, 0] : f32 from vector<1x1x1xf32>
      %85 = math.sqrt %84 : f32
      %cst_51 = arith.constant 1.000000e+02 : f32
      %86 = arith.divf %85, %cst_51 : f32
      %87 = vector.broadcast %86 : f32 to vector<1x1xf32>
      %c0_52 = arith.constant 0 : index
      %c0_53 = arith.constant 0 : index
      %88 = vector.load %arg5[%c0_52, %c0_53] : memref<1x1xf32, #tpu.memory_space<vmem>>, vector<1x1xf32>
      tpu.vector_store %arg5[%c0_52, %c0_53], %87 {strides = array<i32>} : memref<1x1xf32, #tpu.memory_space<vmem>>, vector<1x1xf32>,
    } else {
    }
    return
  }
  func.func @transform_0(%arg0: i32) -> (i32, i32) {
    %c0_i32 = arith.constant 0 : i32
    %c0_i32_0 = arith.constant 0 : i32
    return %arg0, %c0_i32 : i32, i32
  }
  func.func @transform_1(%arg0: i32) -> (i32, i32) {
    %c0_i32 = arith.constant 0 : i32
    %c0_i32_0 = arith.constant 0 : i32
    %c0_i32_1 = arith.constant 0 : i32
    return %c0_i32, %c0_i32_0 : i32, i32
  }
  func.func @transform_2(%arg0: i32) -> (i32, i32) {
    %c0_i32 = arith.constant 0 : i32
    %c0_i32_0 = arith.constant 0 : i32
    %c0_i32_1 = arith.constant 0 : i32
    return %c0_i32, %c0_i32_0 : i32, i32
  }
  func.func @transform_3(%arg0: i32) -> (i32, i32, i32) {
    %c0_i32 = arith.constant 0 : i32
    %c0_i32_0 = arith.constant 0 : i32
    %c0_i32_1 = arith.constant 0 : i32
    return %arg0, %c0_i32, %c0_i32_0 : i32, i32, i32
  }
  func.func @transform_4(%arg0: i32) -> (i32, i32) {
    %c0_i32 = arith.constant 0 : i32
    %c0_i32_0 = arith.constant 0 : i32
    %c0_i32_1 = arith.constant 0 : i32
    return %c0_i32, %c0_i32_0 : i32, i32
  }
}

</mosaic_0001>

<bundles_post_ra>
// kernel: tpu_custom_call.1
= control target key start
LH: loop header
LB: loop body
LE: loop exit
PB: predicated region body
PF: predicated region fallthrough
CT: control target
= control target key end

     0   :  { %10 = vsyncpa [#allocation8], 0  ;;  %vm138_vm0 = vcmask 261120   ;;  %s2107_s0 = inlined_call_operand.vmem [shape: f32[128,32], index: 0, kind: input, shape index: {}]   ;;  %s2108_s1 = inlined_call_operand.vmem [shape: f32[32,6], index: 1, kind: input, shape index: {}]   ;;  %s2109_s2 = inlined_call_operand.vmem [shape: f32[1,6], index: 2, kind: input, shape index: {}]   ;;  %s2110_s3 = inlined_call_operand.hbm [shape: f32[1,1,128], index: 3, kind: output, shape index: {0}]   ;;  %s2111_s4 = inlined_call_operand.hbm [shape: f32[1,1], index: 4, kind: output, shape index: {1}]  }
   0x1   :  { %v127_v0 = vld [vmem:[%s2108_s1] sm:$0xff]  ;;  %v128_v1 = vld [vmem:[%s2108_s1 + $0x8] sm:$0xff]  ;;  %v129_v2 = vld [vmem:[%s2108_s1 + $0x10] sm:$0xff] }
   0x2   :  { %v1574_v3 = vpack.c.bf16 %v128_v1, %v127_v0  ;;  %v130_v4 = vld [vmem:[%s2108_s1 + $0x18] sm:$0xff]  ;;  %v111_v5 = vld [vmem:[%s2107_s0] sm:$0xff] }
   0x3   :  { %v1578_v6 = vpack.c.bf16 %v130_v4, %v129_v2  ;;  %1435 = vmatprep.mubr.msk.f32.mxu0 %vm138_vm0, %v111_v5 }
   0x4   :  { %1575 = vmatprep.subr.bf16.mxu0 %v1574_v3 }
   0x5   :  { %1577 = vmatpush3.bf16.msra.mxu0 %v1574_v3 }
   0x6   :  { %1579 = vmatprep.subr.bf16.mxu0 %v1578_v6 }
   0x7   :  { %11 = vsyncpa [#allocation10], 0  ;;  %v112_v7 = vld [vmem:[%s2107_s0 + $0x8] sm:$0xff]  ;;  %v113_v8 = vld [vmem:[%s2107_s0 + $0x10] sm:$0xff]  ;;  %v1756_v22 = vmov 0.0|0.0   ;;  %vm25_vm1 = vcmask 40960  }
   0x8   :  { %v114_v9 = vld [vmem:[%s2107_s0 + $0x18] sm:$0xff]  ;;  %v115_v10 = vld [vmem:[%s2107_s0 + $0x20] sm:$0xff]  ;;  %v116_v11 = vld [vmem:[%s2107_s0 + $0x28] sm:$0xff]  ;;  %1582 = vmatprep.subr.bf16.mxu1 %v1756_v22  ;;  %v1757_v23 = vmov 0.0   ;;  %vm739_vm2 = vcmask 48128   ;;  %vm1758_vm3 = vmmov 0  }
   0x9   :  { %1581 = vmatpush3.bf16.msra.mxu0 %v1578_v6  ;;  %v117_v12 = vld [vmem:[%s2107_s0 + $0x30] sm:$0xff]  ;;  %v118_v13 = vld [vmem:[%s2107_s0 + $0x38] sm:$0xff]  ;;  %v119_v14 = vld [vmem:[%s2107_s0 + $0x40] sm:$0xff]  ;;  %26 = vst.msk [vmem:[#allocation4] sm:$0x1] %vm25_vm1, %v1757_v23  ;;  %1491 = vmatprep.mubr.msk.f32.mxu1 %vm1758_vm3, %v1757_v23  ;;  %vm1052_vm4 = vcmask 1040384  }
   0xa   :  { %v120_v15 = vld [vmem:[%s2107_s0 + $0x48] sm:$0xff]  ;;  %v121_v16 = vld [vmem:[%s2107_s0 + $0x50] sm:$0xff]  ;;  %v122_v17 = vld [vmem:[%s2107_s0 + $0x58] sm:$0xff]  ;;  %1606 = vmatprep.subr.bf16.mxu0 %v1756_v22  ;;  %27 = vst.msk [vmem:[#allocation5] sm:$0x1] %vm25_vm1, %v1757_v23  ;;  %vm22_vm5 = vcmask 46080  }
   0xb   :  { %v123_v18 = vld [vmem:[%s2107_s0 + $0x60] sm:$0xff]  ;;  %v124_v19 = vld [vmem:[%s2107_s0 + $0x68] sm:$0xff]  ;;  %v125_v20 = vld [vmem:[%s2107_s0 + $0x70] sm:$0xff]  ;;  %23 = vst.msk [vmem:[#allocation2] sm:$0x3f] %vm22_vm5, %v1757_v23  ;;  %vm1048_vm6 = vcmask 7168  }
   0xc   :  { %1436 = vmatmul.mubr.msk.f32.vlgmr.msra.gmra.mrb[0].mxu0 %vm138_vm0, %v112_v7  ;;  %v126_v21 = vld [vmem:[%s2107_s0 + $0x78] sm:$0xff]  ;;  %v1873_v24 = vld [vmem:[%s2109_s2] ss:$0 sm:$0xff]  ;;  %s1759_s0 = smov 123   ;;  %24 = vst.msk [vmem:[#allocation3] sm:$0x3f] %vm22_vm5, %v1757_v23 }
   0xd   :  { %1438 = vmatprep.mubr.msk.f32.mxu0 %vm138_vm0, %v113_v8  ;;  %s1761_s2 = smov [#allocation7]  }
   0xe   :  { %s1276_s29 = sshll.u32 %s1761_s2, 4  ;;  %s1277_s29 = int_to_ptr.vmem [resolvable:$true] %s1276_s29 }
   0xf   :  { %s1708_s30 = scalar_lea.vmem %s1277_s29, 16  ;;  %s1712_s5 = scalar_lea.vmem %s1277_s29, 32 }
  0x10   :  { %1439 = vmatmul.mubr.msk.f32.gmra.mrb[2].mxu0 %vm138_vm0, %v114_v9  ;;  %p1709_p0 = scmp.ne.s32.totalorder %s1277_s29, %s1708_s30  ;;  %p1713_p1 = scmp.lt.s32.totalorder %s1277_s29, %s1277_s29 }
  0x11   :  { %1441 = vmatprep.mubr.msk.f32.mxu0 %vm138_vm0, %v115_v10  ;;  %p1714_p2 = scmp.lt.s32.totalorder %s1712_s5, %s1708_s30 }
  0x13   :  { %p1715_p3 = por %p1714_p2, %p1713_p1 }
  0x14   :  { %1442 = vmatmul.mubr.msk.f32.gmra.mrb[4].mxu0 %vm138_vm0, %v116_v11 }
  0x15   :  { %1444 = vmatprep.mubr.msk.f32.mxu0 %vm138_vm0, %v117_v12  ;;  %p1716_p4 = pnand %p1715_p3, %p1709_p0 }
  0x18   :  { %1445 = vmatmul.mubr.msk.f32.gmra.mrb[6].mxu0 %vm138_vm0, %v118_v13 }
  0x19   :  { %1447 = vmatprep.mubr.msk.f32.mxu0 %vm138_vm0, %v119_v14 }
  0x1c   :  { %1448 = vmatmul.mubr.msk.f32.gmra.mrb[8].mxu0 %vm138_vm0, %v120_v15 }
  0x1d   :  { %1450 = vmatprep.mubr.msk.f32.mxu0 %vm138_vm0, %v121_v16 }
  0x20   :  { %1451 = vmatmul.mubr.msk.f32.gmra.mrb[10].mxu0 %vm138_vm0, %v122_v17 }
  0x21   :  { %1453 = vmatprep.mubr.msk.f32.mxu0 %vm138_vm0, %v123_v18 }
  0x24   :  { %1454 = vmatmul.mubr.msk.f32.gmra.mrb[12].mxu0 %vm138_vm0, %v124_v19 }
  0x25   :  { %1456 = vmatprep.mubr.msk.f32.mxu0 %vm138_vm0, %v125_v20 }
  0x28   :  { %1457 = vmatmul.mubr.msk.f32.gmra.mrb[14].mxu0 %vm138_vm0, %v126_v21 }
  0x29   :  { %1526 = vmatprep.mubr.msk.f32.mxu0 %vm1758_vm3, %v1757_v23 }
  0xdf   :  { %v1437_v25 = vpop.f32.mrb[0].mxu0 }
  0xe0   :  { %v1876_v26 = vadd.f32 %v1437_v25, %v1873_v24  ;;  %v253_v27 = vpop.f32.mrb[1].mxu0 }
  0xe1   :  { %v1879_v28 = vadd.f32 %v1873_v24, %v253_v27 }
  0xe2   :  { %v496_v29 = vmul.f32 0.0, %v1876_v26  ;;  %v782_v44 = vsel %vm739_vm2, %v1876_v26, 0.0 }
  0xe3   :  { %v1440_v30 = vpop.f32.mrb[2].mxu0  ;;  %v511_v31 = vmul.f32 0.0, %v1879_v28  ;;  %v740_v35 = vsel %vm739_vm2, %v1879_v28, 0.0 }
  0xe4   :  { %v1884_v32 = vadd.f32 %v1440_v30, %v1873_v24  ;;  %v263_v33 = vpop.f32.mrb[3].mxu0  ;;  %v1583_v34 = vpack.c.bf16 %v496_v29, %v1879_v28  ;;  %v741_v37 = vsel %vm739_vm2, %v496_v29, 0.0  ;;  %v1667_v52 = vpack.i.bf16 %v1876_v26, %v496_v29 }
  0xe5   :  { %v1890_v36 = vadd.f32 %v1873_v24, %v263_v33  ;;  %v1665_v38 = vpack.i.bf16 %v511_v31, %v1879_v28  ;;  %v781_v39 = vsel %vm739_vm2, %v511_v31, 0.0  ;;  %v1607_v41 = vpack.c.bf16 %v1876_v26, %v511_v31 }
  0xe6   :  { %v1896_v40 = vmul.f32 0.0, %v1884_v32  ;;  %1584 = vmatpush3.bf16.msra.mxu1 %v1583_v34  ;;  %v742_v45 = vadd.f32 %v741_v37, %v740_v35  ;;  %v783_v47 = vadd.f32 %v782_v44, %v781_v39 }
  0xe7   :  { %v497_v42 = vmul.f32 0.0, %v1890_v36  ;;  %v1443_v43 = vpop.f32.mrb[4].mxu0  ;;  %1666 = vxpose.xlu0.b32.start [1/16] (narrow) %v1665_v38, 8  ;;  %1585 = vmatprep.subr.bf16.mxu1 %v1756_v22 }
  0xe8   :  { %v1904_v46 = vadd.f32 %v1443_v43, %v1873_v24  ;;  %1608 = vmatpush3.bf16.msra.mxu0 %v1607_v41  ;;  %v273_v48 = vpop.f32.mrb[5].mxu0  ;;  %v745_v56 = vsel %vm739_vm2, %v1896_v40, 0.0  ;;  %v1671_v16 = vpack.i.bf16 %v1896_v40, %v1896_v40 }
  0xe9   :  { %v743_v49 = vsel %vm739_vm2, %v497_v42, 0.0  ;;  %v1908_v50 = vadd.f32 %v1873_v24, %v273_v48  ;;  %1609 = vmatprep.subr.bf16.mxu0 %v1756_v22  ;;  %v1586_v51 = vpack.c.bf16 %v1896_v40, %v497_v42  ;;  %v1669_v2 = vpack.i.bf16 %v497_v42, %v497_v42 }
  0xea   :  { %v1916_v53 = vmul.f32 0.0, %v1904_v46  ;;  %v744_v54 = vadd.f32 %v743_v49, %v742_v45  ;;  %v785_v55 = vadd.f32 %v783_v47, %v743_v49 }
  0xeb   :  { %v499_v57 = vmul.f32 0.0, %v1908_v50  ;;  %v1446_v58 = vpop.f32.mrb[6].mxu0  ;;  %1587 = vmatpush3.bf16.msra.mxu1 %v1586_v51  ;;  %1668 = vxpose.xlu0.b32.cont [2/16] (narrow) %v1667_v52, 8 }
  0xec   :  { %v746_v59 = vadd.f32 %v745_v56, %v744_v54  ;;  %v787_v60 = vadd.f32 %v785_v55, %v745_v56  ;;  %v1924_v61 = vadd.f32 %v1446_v58, %v1873_v24  ;;  %1611 = vmatpush3.bf16.msra.mxu0 %v1586_v51  ;;  %v283_v62 = vpop.f32.mrb[7].mxu0  ;;  %1588 = vmatprep.subr.bf16.mxu1 %v1756_v22  ;;  %v749_v6 = vsel %vm739_vm2, %v1916_v53, 0.0 }
  0xed   :  { %v747_v63 = vsel %vm739_vm2, %v499_v57, 0.0  ;;  %v1929_v0 = vadd.f32 %v1873_v24, %v283_v62  ;;  %1612 = vmatprep.subr.bf16.mxu0 %v1756_v22  ;;  %v1589_v1 = vpack.c.bf16 %v1916_v53, %v499_v57  ;;  %v1673_v37 = vpack.i.bf16 %v499_v57, %v499_v57 }
  0xee   :  { %v748_v3 = vadd.f32 %v747_v63, %v746_v59  ;;  %v789_v4 = vadd.f32 %v787_v60, %v747_v63  ;;  %v1934_v5 = vmul.f32 0.0, %v1924_v61  ;;  %v1675_v54 = vpack.i.bf16 %v1916_v53, %v1916_v53 }
  0xef   :  { %v1939_v7 = vmul.f32 0.0, %v1929_v0  ;;  %v1449_v8 = vpop.f32.mrb[8].mxu0  ;;  %1590 = vmatpush3.bf16.msra.mxu1 %v1589_v1  ;;  %1670 = vxpose.xlu0.b32.cont [3/16] (narrow) %v1669_v2, 8 }
  0xf0   :  { %v750_v9 = vadd.f32 %v749_v6, %v748_v3  ;;  %v791_v10 = vadd.f32 %v789_v4, %v749_v6  ;;  %v1942_v11 = vadd.f32 %v1449_v8, %v1873_v24  ;;  %1614 = vmatpush3.bf16.msra.mxu0 %v1589_v1  ;;  %v293_v12 = vpop.f32.mrb[9].mxu0  ;;  %1591 = vmatprep.subr.bf16.mxu1 %v1756_v22  ;;  %v753_v20 = vsel %vm739_vm2, %v1934_v5, 0.0 }
  0xf1   :  { %v751_v13 = vsel %vm739_vm2, %v1939_v7, 0.0  ;;  %v1948_v14 = vadd.f32 %v1873_v24, %v293_v12  ;;  %1615 = vmatprep.subr.bf16.mxu0 %v1756_v22  ;;  %v1592_v15 = vpack.c.bf16 %v1934_v5, %v1939_v7  ;;  %v1677_v6 = vpack.i.bf16 %v1939_v7, %v1939_v7 }
  0xf2   :  { %v752_v17 = vadd.f32 %v751_v13, %v750_v9  ;;  %v793_v18 = vadd.f32 %v791_v10, %v751_v13  ;;  %v1956_v19 = vmul.f32 0.0, %v1942_v11 }
  0xf3   :  { %v1961_v21 = vmul.f32 0.0, %v1948_v14  ;;  %v1452_v25 = vpop.f32.mrb[10].mxu0  ;;  %1593 = vmatpush3.bf16.msra.mxu1 %v1592_v15  ;;  %1672 = vxpose.xlu0.b32.cont [4/16] (narrow) %v1671_v16, 8 }
  0xf4   :  { %v754_v27 = vadd.f32 %v753_v20, %v752_v17  ;;  %v795_v29 = vadd.f32 %v793_v18, %v753_v20  ;;  %v1964_v30 = vadd.f32 %v1452_v25, %v1873_v24  ;;  %1617 = vmatpush3.bf16.msra.mxu0 %v1592_v15  ;;  %v303_v31 = vpop.f32.mrb[11].mxu0  ;;  %1594 = vmatprep.subr.bf16.mxu1 %v1756_v22  ;;  %v757_v41 = vsel %vm739_vm2, %v1956_v19, 0.0 }
  0xf5   :  { %v755_v33 = vsel %vm739_vm2, %v1961_v21, 0.0  ;;  %v1970_v34 = vadd.f32 %v1873_v24, %v303_v31  ;;  %1618 = vmatprep.subr.bf16.mxu0 %v1756_v22  ;;  %v1595_v35 = vpack.c.bf16 %v1956_v19, %v1961_v21  ;;  %v1679_v17 = vpack.i.bf16 %v1934_v5, %v1934_v5 }
  0xf6   :  { %v756_v38 = vadd.f32 %v755_v33, %v754_v27  ;;  %v797_v39 = vadd.f32 %v795_v29, %v755_v33  ;;  %v1976_v40 = vmul.f32 0.0, %v1964_v30  ;;  %v1681_v31 = vpack.i.bf16 %v1961_v21, %v1961_v21 }
  0xf7   :  { %v1981_v42 = vmul.f32 0.0, %v1970_v34  ;;  %v1455_v43 = vpop.f32.mrb[12].mxu0  ;;  %1596 = vmatpush3.bf16.msra.mxu1 %v1595_v35  ;;  %1674 = vxpose.xlu0.b32.cont [5/16] (narrow) %v1673_v37, 8 }
  0xf8   :  { %v758_v44 = vadd.f32 %v757_v41, %v756_v38  ;;  %v799_v45 = vadd.f32 %v797_v39, %v757_v41  ;;  %v1984_v47 = vadd.f32 %v1455_v43, %v1873_v24  ;;  %1620 = vmatpush3.bf16.msra.mxu0 %v1595_v35  ;;  %v313_v48 = vpop.f32.mrb[13].mxu0  ;;  %1597 = vmatprep.subr.bf16.mxu1 %v1756_v22  ;;  %v761_v58 = vsel %vm739_vm2, %v1976_v40, 0.0 }
  0xf9   :  { %v759_v49 = vsel %vm739_vm2, %v1981_v42, 0.0  ;;  %v1990_v51 = vadd.f32 %v1873_v24, %v313_v48  ;;  %1621 = vmatprep.subr.bf16.mxu0 %v1756_v22  ;;  %v1598_v52 = vpack.c.bf16 %v1976_v40, %v1981_v42  ;;  %v1683_v38 = vpack.i.bf16 %v1956_v19, %v1956_v19 }
  0xfa   :  { %v760_v55 = vadd.f32 %v759_v49, %v758_v44  ;;  %v801_v56 = vadd.f32 %v799_v45, %v759_v49  ;;  %v1998_v57 = vmul.f32 0.0, %v1984_v47  ;;  %v1685_v45 = vpack.i.bf16 %v1981_v42, %v1981_v42  ;;  %v738_v49 = vld [vmem:[#allocation4] sm:$0x1] }
  0xfb   :  { %v2003_v59 = vmul.f32 0.0, %v1990_v51  ;;  %v1458_v60 = vpop.f32.mrb[14].mxu0  ;;  %1599 = vmatpush3.bf16.msra.mxu1 %v1598_v52  ;;  %1676 = vxpose.xlu0.b32.cont [6/16] (narrow) %v1675_v54, 8 }
  0xfc   :  { %v762_v62 = vadd.f32 %v761_v58, %v760_v55  ;;  %v803_v63 = vadd.f32 %v801_v56, %v761_v58  ;;  %v2006_v1 = vadd.f32 %v1458_v60, %v1873_v24  ;;  %1623 = vmatpush3.bf16.msra.mxu0 %v1598_v52  ;;  %v323_v53 = vpop.f32.mrb[15].mxu0  ;;  %1600 = vmatprep.subr.bf16.mxu1 %v1756_v22  ;;  %v765_v12 = vsel %vm739_vm2, %v1998_v57, 0.0  ;;  %v780_v52 = vld [vmem:[#allocation5] sm:$0x1] }
  0xfd   :  { %v763_v2 = vsel %vm739_vm2, %v2003_v59, 0.0  ;;  %v2012_v3 = vadd.f32 %v1873_v24, %v323_v53  ;;  %1624 = vmatprep.subr.bf16.mxu0 %v1756_v22  ;;  %v1601_v4 = vpack.c.bf16 %v1998_v57, %v2003_v59  ;;  %v1687_v56 = vpack.i.bf16 %v1976_v40, %v1976_v40 }
  0xfe   :  { %v764_v8 = vadd.f32 %v763_v2, %v762_v62  ;;  %v805_v9 = vadd.f32 %v803_v63, %v763_v2  ;;  %v510_v10 = vmul.f32 0.0, %v2006_v1  ;;  %v1689_v42 = vpack.i.bf16 %v2003_v59, %v2003_v59 }
  0xff   :  { %v509_v13 = vmul.f32 0.0, %v2012_v3  ;;  %1602 = vmatpush3.bf16.msra.mxu1 %v1601_v4  ;;  %1678 = vxpose.xlu0.b32.cont [7/16] (narrow) %v1677_v6, 8  ;;  %v1691_v60 = vpack.i.bf16 %v1998_v57, %v1998_v57  ;;  %v28_v6 = vlaneseq }
 0x100   :  { %v766_v24 = vadd.f32 %v765_v12, %v764_v8  ;;  %v807_v15 = vadd.f32 %v805_v9, %v765_v12  ;;  %1626 = vmatpush3.bf16.msra.mxu0 %v1601_v4  ;;  %1603 = vmatprep.subr.bf16.mxu1 %v1756_v22  ;;  %v769_v25 = vsel %vm739_vm2, %v510_v10, 0.0  ;;  %v1695_v53 = vpack.i.bf16 %v510_v10, %v510_v10 }
 0x101   :  { %v767_v16 = vsel %vm739_vm2, %v509_v13, 0.0  ;;  %1627 = vmatprep.subr.bf16.mxu0 %v1756_v22  ;;  %v1604_v7 = vpack.c.bf16 %v510_v10, %v509_v13  ;;  %v1693_v63 = vpack.i.bf16 %v509_v13, %v509_v13  ;;  %v29_v8 = vshrl.u32 %v28_v6, 7 }
 0x102   :  { %v768_v18 = vadd.f32 %v767_v16, %v766_v24  ;;  %v809_v20 = vadd.f32 %v807_v15, %v767_v16  ;;  %v46_v9 = vand.u32 127, %v28_v6  ;;  %v1760_v16 = vmov 1.0|1.0  }
 0x103   :  { %1605 = vmatpush3.bf16.msra.mxu1 %v1604_v7  ;;  %1680 = vxpose.xlu0.b32.cont [8/16] (narrow) %v1679_v17, 8  ;;  %v30_v10 = vadd.s32 8, %v29_v8  ;;  %v31_v12 = vadd.s32 16, %v29_v8  ;;  %v32_v13 = vadd.s32 24, %v29_v8  ;;  %v33_v24 = vadd.s32 32, %v29_v8 }
 0x104   :  { %v770_v27 = vadd.f32 %v769_v25, %v768_v18  ;;  %v811_v29 = vadd.f32 %v809_v20, %v769_v25  ;;  %1629 = vmatpush3.bf16.msra.mxu0 %v1604_v7  ;;  %1630 = vmatprep.subr.bf16.mxu1 %v1756_v22  ;;  %vm47_vm7 = vcmp.eq.s32.totalorder %v29_v8, %v46_v9  ;;  %v34_v15 = vadd.s32 40, %v29_v8 }
 0x105   :  { %1564 = vmatprep.subr.mxu0 %v1757_v23  ;;  %vm48_vm8 = vcmp.eq.s32.totalorder %v30_v10, %v46_v9  ;;  %vm49_vm9 = vcmp.eq.s32.totalorder %v31_v12, %v46_v9  ;;  %vm50_vm10 = vcmp.eq.s32.totalorder %v32_v13, %v46_v9  ;;  %vm51_vm13 = vcmp.eq.s32.totalorder %v33_v24, %v46_v9 }
 0x106   :  { %v771_v33 = vrot.slane %v770_v27, 4  ;;  %v812_v35 = vrot.slane %v811_v29, 4  ;;  %vm1631_vm11 = vmpackc.low %vm48_vm8, %vm47_vm7  ;;  %vm52_vm14 = vcmp.eq.s32.totalorder %v34_v15, %v46_v9  ;;  %v35_v7 = vadd.s32 48, %v29_v8 }
 0x107   :  { %1682 = vxpose.xlu0.b32.cont [9/16] (narrow) %v1681_v31, 8  ;;  %vm1634_vm12 = vmpackc.low %vm50_vm10, %vm49_vm9  ;;  %v36_v17 = vadd.s32 56, %v29_v8  ;;  %v37_v18 = vadd.s32 64, %v29_v8  ;;  %v38_v20 = vadd.s32 72, %v29_v8  ;;  %v39_v25 = vadd.s32 80, %v29_v8 }
 0x108   :  { %v772_v5 = vadd.f32 %v771_v33, %v770_v27  ;;  %v813_v37 = vadd.f32 %v812_v35, %v811_v29  ;;  %vm1637_vm15 = vmpackc.low %vm52_vm14, %vm51_vm13  ;;  %vm53_vm0 = vcmp.eq.s32.totalorder %v35_v7, %v46_v9  ;;  %v40_v27 = vadd.s32 88, %v29_v8 }
 0x109   :  { %vm57_vm7 = vcmp.eq.s32.totalorder %v39_v25, %v46_v9  ;;  %v41_v29 = vadd.s32 96, %v29_v8  ;;  %v42_v31 = vadd.s32 104, %v29_v8  ;;  %v43_v33 = vadd.s32 112, %v29_v8 }
 0x10a   :  { %v773_v39 = vrot.slane %v772_v5, 2  ;;  %v814_v41 = vrot.slane %v813_v37, 2  ;;  %vm58_vm8 = vcmp.eq.s32.totalorder %v40_v27, %v46_v9  ;;  %v44_v35 = vadd.s32 120, %v29_v8 }
 0x10b   :  { %1684 = vxpose.xlu0.b32.cont [10/16] (narrow) %v1683_v38, 8  ;;  %vm1646_vm9 = vmpackc.low %vm58_vm8, %vm57_vm7  ;;  %vm59_vm10 = vcmp.eq.s32.totalorder %v41_v29, %v46_v9  ;;  %vm61_vm13 = vcmp.eq.s32.totalorder %v43_v33, %v46_v9  ;;  %v527_v38 = vld [vmem:[#allocation2] sm:$0x3f] }
 0x10c   :  { %v774_v43 = vadd.f32 %v773_v39, %v772_v5  ;;  %v815_v44 = vadd.f32 %v814_v41, %v813_v37  ;;  %vm62_vm14 = vcmp.eq.s32.totalorder %v44_v35, %v46_v9  ;;  %v633_v37 = vld [vmem:[#allocation3] sm:$0x3f] }
 0x10e   :  { %v775_v48 = vrot.slane %v774_v43, 1  ;;  %v816_v21 = vrot.slane %v815_v44, 1 }
 0x10f   :  { %1686 = vxpose.xlu0.b32.cont [11/16] (narrow) %v1685_v45, 8 }
 0x110   :  { %v776_v54 = vadd.f32 %v775_v48, %v774_v43  ;;  %v817_v55 = vadd.f32 %v816_v21, %v815_v44 }
 0x112   :  { %v777_v58 = vadd.f32 %v776_v54, %v738_v49  ;;  %v818_v19 = vadd.f32 %v817_v55, %v780_v52 }
 0x113   :  { %1688 = vxpose.xlu0.b32.cont [12/16] (narrow) %v1687_v56, 8 }
 0x114   :  { %779 = vst.msk [vmem:[#allocation4] sm:$0x1] %vm25_vm1, %v777_v58  ;;  %819 = vst.msk [vmem:[#allocation5] sm:$0x1] %vm25_vm1, %v818_v19  ;;  %vm54_vm1 = vcmp.eq.s32.totalorder %v36_v17, %v46_v9 }
 0x115   :  { %vm1640_vm2 = vmpackc.low %vm54_vm1, %vm53_vm0  ;;  %vm1244_vm0 = vcmask 36864  }
 0x117   :  { %1690 = vxpose.xlu0.b32.cont [13/16] (narrow) %v1689_v42, 8 }
 0x11b   :  { %1692 = vxpose.xlu0.b32.cont [14/16] (narrow) %v1691_v60, 8  ;;  %v1012_v62 = vld [vmem:[#allocation4] sm:$0x1]  ;;  %v1013_v40 = vld [vmem:[#allocation5] sm:$0x1] }
 0x11c   :  { %1016 = vxpose.xlu1.b32.start.end [1/1] (short) (narrow) %v1012_v62, 8 }
 0x11f   :  { %1694 = vxpose.xlu0.b32.cont [15/16] (narrow) %v1693_v63, 8 }
 0x120   :  { %1131 = vxpose.xlu1.b32.start.end [1/1] (short) (narrow) %v1013_v40, 8 }
 0x123   :  { %1696 = vxpose.xlu0.b32.end [16/16] (narrow) %v1695_v53, 8 }
 0x13e   :  { %852 = vrot.lane.b32.xlu1 %v1879_v28, %s1759_s0 }
 0x142   :  { %854 = vrot.lane.b32.xlu1 %v1876_v26, %s1759_s0 }
 0x146   :  { %856 = vrot.lane.b32.xlu1 %v1890_v36, %s1759_s0 }
 0x14a   :  { %858 = vrot.lane.b32.xlu1 %v1884_v32, %s1759_s0 }
 0x14c   :  { %868 = vrot.lane.b32.xlu0 %v1948_v14, %s1759_s0 }
 0x14e   :  { %860 = vrot.lane.b32.xlu1 %v1908_v50, %s1759_s0 }
 0x152   :  { %862 = vrot.lane.b32.xlu1 %v1904_v46, %s1759_s0 }
 0x156   :  { %864 = vrot.lane.b32.xlu1 %v1929_v0, %s1759_s0 }
 0x15a   :  { %866 = vrot.lane.b32.xlu1 %v1924_v61, %s1759_s0 }
 0x15e   :  { %870 = vrot.lane.b32.xlu1 %v1942_v11, %s1759_s0 }
 0x162   :  { %872 = vrot.lane.b32.xlu1 %v1970_v34, %s1759_s0 }
 0x166   :  { %874 = vrot.lane.b32.xlu1 %v1964_v30, %s1759_s0 }
 0x167   :  { %v1697_v26 = vpop.trf.xlu0 }
 0x168   :  { %v1701_v28 = vunpack.i.h.bf16 %v1697_v26  ;;  %v1698_v32 = vunpack.i.l.bf16 %v1697_v26 }
 0x16a   :  { %1527 = vmatmul.mubr.f32.vlgmr.msra.gmra.mrb[16].mxu0 %v1701_v28  ;;  %876 = vrot.lane.b32.xlu1 %v1990_v51, %s1759_s0 }
 0x16b   :  { %1565 = vmatpush3.msk.msra.mxu0 %vm1052_vm4, %v1012_v62  ;;  %1492 = vmatmul.mubr.f32.vlgmr.msra.gmra.mrb[0].mxu1 %v1698_v32 }
 0x16c   :  { %1566 = vmatprep.mubr.msk.f32.mxu0 %vm1758_vm3, %v1757_v23  ;;  %1569 = vmatprep.subr.mxu0 %v1757_v23 }
 0x16d   :  { %1561 = vmatprep.mubr.msk.f32.mxu1 %vm1758_vm3, %v1757_v23  ;;  %1632 = vmatpush3.bf16.msk.msra.mxu1 %vm1631_vm11, %v1760_v16  ;;  %vm60_vm11 = vcmp.eq.s32.totalorder %v42_v31, %v46_v9 }
 0x16e   :  { %878 = vrot.lane.b32.xlu1 %v1984_v47, %s1759_s0  ;;  %1633 = vmatprep.subr.bf16.mxu1 %v1756_v22 }
 0x171   :  { %1635 = vmatpush3.bf16.msk.msra.mxu1 %vm1634_vm12, %v1760_v16  ;;  %vm1649_vm12 = vmpackc.low %vm60_vm11, %vm59_vm10 }
 0x172   :  { %880 = vrot.lane.b32.xlu1 %v2012_v3, %s1759_s0  ;;  %1636 = vmatprep.subr.bf16.mxu1 %v1756_v22 }
 0x175   :  { %1638 = vmatpush3.bf16.msk.msra.mxu1 %vm1637_vm15, %v1760_v16  ;;  %vm1652_vm15 = vmpackc.low %vm62_vm14, %vm61_vm13 }
 0x176   :  { %882 = vrot.lane.b32.xlu1 %v2006_v1, %s1759_s0  ;;  %1639 = vmatprep.subr.bf16.mxu1 %v1756_v22 }
 0x179   :  { %1641 = vmatpush3.bf16.msk.msra.mxu1 %vm1640_vm2, %v1760_v16 }
 0x17a   :  { %1642 = vmatprep.subr.bf16.mxu1 %v1756_v22 }
 0x19c   :  { %v1032_v36 = vpop.trf.xlu1 }
 0x19d   :  { %1567 = vmatmul.mubr.msk.f32.vlgmr.msra.gmra.mrb[18].mxu0 %vm1048_vm6, %v1032_v36 }
 0x19e   :  { %1570 = vmatpush3.msk.msra.mxu0 %vm1052_vm4, %v1013_v40  ;;  %1571 = vmatprep.mubr.msk.f32.mxu0 %vm1758_vm3, %v1757_v23  ;;  %vm55_vm3 = vcmp.eq.s32.totalorder %v37_v18, %v46_v9  ;;  %vm56_vm4 = vcmp.eq.s32.totalorder %v38_v20, %v46_v9 }
 0x1a0   :  { %v1147_v46 = vpop.trf.xlu1 }
 0x1a1   :  { %1572 = vmatmul.mubr.msk.f32.vlgmr.msra.gmra.mrb[20].mxu0 %vm1048_vm6, %v1147_v46  ;;  %vm1643_vm6 = vmpackc.low %vm56_vm4, %vm55_vm3 }
 0x1a2   :  { %1644 = vmatpush3.bf16.msk.msra.mxu1 %vm1643_vm6, %v1760_v16 }
 0x1a3   :  { %1645 = vmatprep.subr.bf16.mxu1 %v1756_v22 }
 0x1a6   :  { %1647 = vmatpush3.bf16.msk.msra.mxu1 %vm1646_vm9, %v1760_v16 }
 0x1a7   :  { %1648 = vmatprep.subr.bf16.mxu1 %v1756_v22 }
 0x1aa   :  { %1650 = vmatpush3.bf16.msk.msra.mxu1 %vm1649_vm12, %v1760_v16 }
 0x1ab   :  { %1651 = vmatprep.subr.bf16.mxu1 %v1756_v22 }
 0x1ae   :  { %1653 = vmatpush3.bf16.msk.msra.mxu1 %vm1652_vm15, %v1760_v16 }
 0x1b0   :  { %v853_v50 = vpop.permute.xlu1 %852 }
 0x1b1   :  { %900 = vxpose.xlu1.b32.start [1/16] (narrow) %v853_v50, 8 }
 0x1b4   :  { %v855_v61 = vpop.permute.xlu1 %854 }
 0x1b5   :  { %901 = vxpose.xlu1.b32.cont [2/16] (narrow) %v855_v61, 8 }
 0x1b8   :  { %v857_v0 = vpop.permute.xlu1 %856 }
 0x1b9   :  { %902 = vxpose.xlu1.b32.cont [3/16] (narrow) %v857_v0, 8 }
 0x1bc   :  { %v859_v11 = vpop.permute.xlu1 %858 }
 0x1bd   :  { %903 = vxpose.xlu1.b32.cont [4/16] (narrow) %v859_v11, 8 }
 0x1be   :  { %v869_v51 = vpop.permute.xlu0 %868 }
 0x1c0   :  { %v861_v14 = vpop.permute.xlu1 %860 }
 0x1c1   :  { %904 = vxpose.xlu1.b32.cont [5/16] (narrow) %v861_v14, 8 }
 0x1c4   :  { %v863_v30 = vpop.permute.xlu1 %862 }
 0x1c5   :  { %905 = vxpose.xlu1.b32.cont [6/16] (narrow) %v863_v30, 8 }
 0x1c8   :  { %v865_v34 = vpop.permute.xlu1 %864 }
 0x1c9   :  { %906 = vxpose.xlu1.b32.cont [7/16] (narrow) %v865_v34, 8 }
 0x1cc   :  { %v867_v47 = vpop.permute.xlu1 %866 }
 0x1cd   :  { %907 = vxpose.xlu1.b32.cont [8/16] (narrow) %v867_v47, 8 }
 0x1d0   :  { %v871_v23 = vpop.permute.xlu1 %870 }
 0x1d1   :  { %908 = vxpose.xlu1.b32.cont [9/16] (narrow) %v869_v51, 8 }
 0x1d4   :  { %v873_v57 = vpop.permute.xlu1 %872 }
 0x1d5   :  { %909 = vxpose.xlu1.b32.cont [10/16] (narrow) %v871_v23, 8 }
 0x1d8   :  { %v875_v59 = vpop.permute.xlu1 %874 }
 0x1d9   :  { %910 = vxpose.xlu1.b32.cont [11/16] (narrow) %v873_v57, 8 }
 0x1dc   :  { %v877_v1 = vpop.permute.xlu1 %876 }
 0x1dd   :  { %911 = vxpose.xlu1.b32.cont [12/16] (narrow) %v875_v59, 8 }
 0x1e0   :  { %v879_v2 = vpop.permute.xlu1 %878 }
 0x1e1   :  { %912 = vxpose.xlu1.b32.cont [13/16] (narrow) %v877_v1, 8 }
 0x1e4   :  { %v881_v3 = vpop.permute.xlu1 %880 }
 0x1e5   :  { %913 = vxpose.xlu1.b32.cont [14/16] (narrow) %v879_v2, 8 }
 0x1e8   :  { %v883_v4 = vpop.permute.xlu1 %882 }
 0x1e9   :  { %914 = vxpose.xlu1.b32.cont [15/16] (narrow) %v881_v3, 8 }
 0x1ed   :  { %915 = vxpose.xlu1.b32.end [16/16] (narrow) %v883_v4, 8 }
 0x231   :  { %v916_v5 = vpop.trf.xlu1 }
 0x232   :  { %1562 = vmatmul.mubr.f32.vlgmr.msra.gmra.mrb[2].mxu1 %v916_v5 }
 0x23d   :  { %v732_v39 = vpop.f32.mrb[16].mxu0 }
 0x23e   :  { %v626_v41 = vpop.f32.mrb[0].mxu1  ;;  %v736_v43 = vadd.f32 %v732_v39, %v633_v37  ;;  %v1528_v44 = vpop.f32.mrb[17].mxu0 }
 0x23f   :  { %v630_v45 = vadd.f32 %v626_v41, %v527_v38  ;;  %v1493_v48 = vpop.f32.mrb[1].mxu1 }
 0x240   :  { %737 = vst.msk [vmem:[#allocation3] sm:$0x3f] %vm22_vm5, %v736_v43 }
 0x241   :  { %632 = vst.msk [vmem:[#allocation2] sm:$0x3f] %vm22_vm5, %v630_v45 }
 0x247   :  { %v1015_v54 = vld [vmem:[#allocation3] sm:$0x3f] }
 0x248   :  { %v1014_v22 = vld [vmem:[#allocation2] sm:$0x3f] }
 0x270   :  { %v1122_v21 = vpop.f32.mrb[18].mxu0 }
 0x271   :  { %v1127_v49 = vmul.f32 0.125, %v1122_v21  ;;  %v1568_v52 = vpop.f32.mrb[19].mxu0 }
 0x273   :  { %v1128_v56 = vsub.f32 %v1014_v22, %v1127_v49 }
 0x274   :  { %v1235_v55 = vpop.f32.mrb[20].mxu0 }
 0x275   :  { %v1239_v58 = vmul.f32 0.125, %v1235_v55  ;;  %v1573_v19 = vpop.f32.mrb[21].mxu0  ;;  %v1130_v60 = vmul.f32 0.14285715, %v1128_v56 }
 0x277   :  { %v1240_v42 = vsub.f32 %v1015_v54, %v1239_v58 }
 0x279   :  { %v1241_v62 = vmul.f32 0.14285715, %v1240_v42 }
 0x27b   :  { %v1242_v63 = vsub.f32 %v1130_v60, %v1241_v62 }
 0x27d   :  { %v1243_v40 = vmul.f32 %v1242_v63, %v1242_v63 }
 0x27f   :  { %v1245_v53 = vsel %vm1244_vm0, %v1243_v40, 0.0 }
 0x280   :  { %1246 = vadd.xlane.f32.xlu0 %v1245_v53 }
 0x305   :  { %v998_v26 = vpop.f32.mrb[2].mxu1 }
 0x306   :  { %v1331_v28 = vmul.f32 -1.442695, %v998_v26  ;;  %v1563_v32 = vpop.f32.mrb[3].mxu1 }
 0x308   :  { %1702 = vpow2.f32 %v1331_v28 }
 0x30d   :  { %v1247_v36 = vpop.xlane.xlu0 %1246 }
 0x30e   :  { %v1248_v46 = vrot.slane %v1247_v36, 4 }
 0x310   :  { %v1249_v50 = vadd.f32 %v1248_v46, %v1247_v36 }
 0x312   :  { %v1703_v61 = vpop.eup %1702  ;;  %v1250_v0 = vrot.slane %v1249_v50, 2 }
 0x313   :  { %v1005_v11 = vadd.f32 1.0, %v1703_v61 }
 0x314   :  { %v1251_v14 = vadd.f32 %v1250_v0, %v1249_v50 }
 0x315   :  { %1704 = vrcp.f32 %v1005_v11 }
 0x316   :  { %v1252_v30 = vrot.slane %v1251_v14, 1 }
 0x318   :  { %v1253_v34 = vadd.f32 %v1252_v30, %v1251_v14 }
 0x31a   :  { %1654 = vpush %v1253_v34 }
 0x31f   :  { %v1705_v47 = vpop.eup %1704 }
 0x320   :  { %1008 = vst [vmem:[#allocation7] sm:$0x1] %v1705_v47 }
 0x321   :  { %1719 = shalt.err (!%p1716_p4)
}
 0x322   :  { %s1720_s8 = scalar_lea.hbm %s2110_s3, 16 }
 0x323   :  { %p1721_p5 = scmp.ne.s32.totalorder %s2110_s3, %s1720_s8  ;;  %p1724_p6 = scmp.lt.u32.totalorder %s1720_s8, %s2110_s3 }
 0x325   :  { %p1726_p7 = pnand %p1724_p6, %p1721_p5 }
 0x327   :  { %1729 = shalt.err (!%p1726_p7)
}
 0x328   :  { %1279 = dma.vmem_to_hbm [thread:$0]  %s1277_s29, 16, %s2110_s3, [#allocation8]   ;;  %vm1268_vm2 = vcmask 0  }
 0x329   :  { %s1762_s16 = smov [#allocation9]  }
 0x32a   :  { %s1286_s17 = sshll.u32 %s1762_s16, 4  ;;  %s1287_s17 = int_to_ptr.vmem [resolvable:$true] %s1286_s17 }
 0x32b   :  { %s1730_s3 = scalar_lea.vmem %s1287_s17, 16  ;;  %s1734_s20 = scalar_lea.vmem %s1287_s17, 32 }
 0x32c   :  { %p1731_p8 = scmp.ne.s32.totalorder %s1287_s17, %s1730_s3  ;;  %p1735_p9 = scmp.lt.s32.totalorder %s1287_s17, %s1287_s17 }
 0x32d   :  { %p1736_p10 = scmp.lt.s32.totalorder %s1734_s20, %s1730_s3 }
 0x32f   :  { %p1737_p11 = por %p1736_p10, %p1735_p9 }
 0x331   :  { %p1738_p12 = pnand %p1737_p11, %p1731_p8 }
 0x34b   :  { %s1655_s15 = spop %1654 }
 0x34c   :  { %v1255_v51 = vstv %s1655_s15 }
 0x34d   :  { %1706 = vrsqrt.f32 %v1255_v51  ;;  %vm1258_vm5 = vcmp.eq.f32.partialorder %v1255_v51, inf  ;;  %v1261_v59 = vand.u32 2147483648, %v1255_v51  ;;  %vm1260_vm1 = vcmp.eq.f32.partialorder %v1255_v51, 0.0 }
 0x357   :  { %v1707_v23 = vpop.eup %1706 }
 0x358   :  { %v1257_v57 = vmul.f32 %v1707_v23, %v1255_v51 }
 0x35a   :  { %v1259_v1 = vsel %vm1258_vm5, %v1255_v51, %v1257_v57 }
 0x35b   :  { %v1262_v2 = vsel %vm1260_vm1, %v1261_v59, %v1259_v1 }
 0x35c   :  { %1656 = vpush %v1262_v2 }
 0x38d   :  { %s1657_s18 = spop %1656 }
 0x38e   :  { %s1266_s19 = smul.f32 0.01, %s1657_s18 }
 0x390   :  { %v1267_v3 = vstv %s1266_s19 }
 0x391   :  { %1269 = vst.msk [vmem:[#allocation9] sm:$0x1] %vm1268_vm2, %v1267_v3 }
 0x392   :  { %1741 = shalt.err (!%p1738_p12)
}
 0x393   :  { %s1742_s23 = scalar_lea.hbm %s2111_s4, 16 }
 0x394   :  { %p1743_p13 = scmp.ne.s32.totalorder %s2111_s4, %s1742_s23  ;;  %p1746_p0 = scmp.lt.u32.totalorder %s1742_s23, %s2111_s4 }
 0x396   :  { %p1748_p1 = pnand %p1746_p0, %p1743_p13 }
 0x398   :  { %1751 = shalt.err (!%p1748_p1)
}
 0x399   :  { %1289 = dma.vmem_to_hbm [thread:$0]  %s1287_s17, 16, %s2111_s4, [#allocation10]  }
 0x39a   :  { %1752 = dma.done.wait [#allocation8], 16  }
 0x39b   :  { %1753 = vsyncadd [#allocation8], 4294967280 }
 0x39c   :  { %1754 = dma.done.wait [#allocation10], 16  }
 0x39d   :  { %1755 = vsyncadd [#allocation10], 4294967280 }
 0x39e   :  { %1296 = vsyncpa [#allocation8], 1 }
 0x39f   :  { %1297 = vsyncpa [#allocation10], 1 }

</bundles_post_ra>
